<compile_context>
chip_gen: v6e
topology: v6e:2x2x1
jax: 0.10.0
libtpu: 0.0.40
codegen_flags: <defaults>
</compile_context>

<pallas_src>
import jax
import jax.numpy as jnp
from jax.experimental import pallas as pl
from jax.experimental.pallas import tpu as pltpu


def _round_up(x, m):
    return ((x + m - 1) // m) * m


def _sublane_multiple(dtype):
    # Sublane packing granularity for the second-to-last dim: f32->8, bf16->16, int8->32.
    itemsize = jnp.dtype(dtype).itemsize
    return max(8, 32 // itemsize)


def eca_kernel(x_ref, wt_ref, o_ref):
    # x_ref:  (Bt, C, HW)  activation tile (native dtype)
    # wt_ref: (C, C)       pre-transposed center tap: wt[c_in, c_out] = w[c_out, c_in, k//2]
    x = x_ref[...]

    # AdaptiveAvgPool2d(1): mean over all spatial positions, accumulated in f32
    # (no explicit full-tile cast materialized).
    pooled = jnp.mean(x, axis=-1, dtype=jnp.float32)                     # (Bt, C) f32

    # Conv1d(C, C, k, padding=k//2) on a length-1 sequence == center-tap matmul.
    # Cast only the tiny pooled vector to the weight dtype; the (C, C) weight
    # tile is used as-is (no per-step full-tile VPU cast).
    gate = jax.nn.sigmoid(
        jnp.dot(pooled.astype(wt_ref.dtype), wt_ref[...],
                preferred_element_type=jnp.float32))                     # (Bt, C) f32

    # Final scale in the activation dtype (bf16 VALU on v6e/v7x). The gate is a
    # per-(b, c) scalar computed in f32, so one rounding is negligible.
    o_ref[...] = (x * gate.astype(x.dtype)[:, :, None]).astype(o_ref.dtype)


def eca_attention(x, conv_weight, *, batch_tile=8, weight_compute_dtype=None):
    """x: (B, C, H, W); conv_weight: (C, C, k) from nn.Conv1d(C, C, k, bias=False)."""
    B, C, H, W = x.shape
    k = conv_weight.shape[-1]
    assert k % 2 == 1, "center-tap reduction of the length-1 Conv1d requires odd k"

    # Only the center tap touches the zero-padded length-1 sequence.
    # Hoist the transpose (and any one-time cast) out of the kernel.
    w_t = jnp.transpose(conv_weight[:, :, k // 2])                       # (C_in, C_out)
    if weight_compute_dtype is not None:
        w_t = w_t.astype(weight_compute_dtype)

    HW = H * W
    x_itemsize = jnp.dtype(x.dtype).itemsize
    w_itemsize = jnp.dtype(w_t.dtype).itemsize

    # ---- VMEM accounting with lane/sublane padding (what VMEM actually holds) ----
    HW_pad = _round_up(HW, 128)
    C_pad_x = _round_up(C, _sublane_multiple(x.dtype))
    w_block_bytes = (_round_up(C, _sublane_multiple(w_t.dtype))
                     * _round_up(C, 128) * w_itemsize)

    def x_block_bytes(bt):  # one buffer of one x-sized operand (input or output)
        return bt * C_pad_x * HW_pad * x_itemsize

    # Chip-aware VMEM budget: ~half of physical capacity for the pipelined blocks.
    try:
        vmem_cap = int(pltpu.get_tpu_info().vmem_capacity_bytes)
    except Exception:
        vmem_cap = 64 * 1024 * 1024        # conservative default (v7x per-core VMEM)
    vmem_budget = vmem_cap // 2

    # ---- batch-tile selection ----
    bt = max(1, min(batch_tile, B))
    # Shrink until double-buffered in+out x blocks plus the (single) weight buffer fit.
    while bt > 1 and 4 * x_block_bytes(bt) + w_block_bytes > vmem_budget:
        bt = max(1, bt // 2)
    # Prefer more grid steps over the biggest tile: per-step overhead (~0.35 us) is
    # amortized once a block is ~1 MiB, and >= 4 steps/core keeps prefetch/writeback
    # overlapped and both v7x TensorCores fed.
    target_steps = min(B, 8)
    min_block_bytes = 1 << 20
    while (bt > 1 and pl.cdiv(B, bt) < target_steps
           and x_block_bytes(max(1, bt // 2)) >= min_block_bytes):
        bt = max(1, bt // 2)

    grid = (pl.cdiv(B, bt),)

    # Scoped VMEM limit with headroom; cap at 3/4 of the physical capacity
    # (~48 MiB on v7x, ~96 MiB on v5e/v6e).
    vmem_limit = int(min(4 * x_block_bytes(bt) + 2 * w_block_bytes + (2 << 20),
                         (vmem_cap * 3) // 4))
    vmem_limit = max(vmem_limit, 16 * 1024 * 1024)

    cost = pl.CostEstimate(
        flops=2 * B * C * HW + 2 * B * C * C,
        transcendentals=B * C,
        bytes_accessed=2 * B * C * HW * x_itemsize + C * C * w_itemsize,
    )

    xf = x.reshape(B, C, HW)

    def build_call(single_buffer_weight):
        if single_buffer_weight and hasattr(pl, "Buffered"):
            # Constant index_map -> single-buffer the weight (no wasted 2x C*C VMEM).
            w_spec = pl.BlockSpec((C, C), lambda b: (0, 0),
                                  pipeline_mode=pl.Buffered(1))
        else:
            w_spec = pl.BlockSpec((C, C), lambda b: (0, 0))
        return pl.pallas_call(
            eca_kernel,
            out_shape=jax.ShapeDtypeStruct((B, C, HW), x.dtype),
            grid_spec=pltpu.PrefetchScalarGridSpec(
                num_scalar_prefetch=0,
                grid=grid,
                in_specs=[
                    pl.BlockSpec((bt, C, HW), lambda b: (b, 0, 0)),
                    w_spec,
                ],
                out_specs=pl.BlockSpec((bt, C, HW), lambda b: (b, 0, 0)),
            ),
            compiler_params=pltpu.CompilerParams(
                dimension_semantics=("parallel",),
                vmem_limit_bytes=vmem_limit,
            ),
            cost_estimate=cost,
        )

    try:
        out = build_call(True)(xf, w_t)
    except Exception:
        # Fallback for jax versions without BlockSpec(pipeline_mode=...) support.
        out = build_call(False)(xf, w_t)
    return out.reshape(B, C, H, W)


def eca_reference(x, conv_weight):
    # Pure-JAX reference mirroring the PyTorch forward exactly.
    k = conv_weight.shape[-1]
    pooled = x.mean(axis=(2, 3))                                         # (B, C)
    y = pooled @ conv_weight[:, :, k // 2].T                             # (B, C)
    y = jax.nn.sigmoid(y)
    return x * y[:, :, None, None]


if __name__ == "__main__":
    B, C, H, W, K = 2, 4, 16, 16, 3

    key = jax.random.PRNGKey(0)
    kx, kw = jax.random.split(key)
    x = jax.random.normal(kx, (B, C, H, W), dtype=jnp.float32)
    # Synthetic Conv1d weight of shape (out_ch, in_ch, k) = (C, C, K), no bias.
    conv_weight = 0.1 * jax.random.normal(kw, (C, C, K), dtype=jnp.float32)

    out = eca_attention(x, conv_weight)
    out = jax.block_until_ready(out)

    ref = eca_reference(x, conv_weight)
    assert out.shape == (B, C, H, W)
    assert jnp.allclose(out, ref, atol=1e-5, rtol=1e-5), "mismatch vs reference"

    print("KERNEL_OK")
</pallas_src>

<mosaic_0001>
module attributes {stable_mosaic.version = 11 : i64} {
  func.func @eca_kernel(%arg0: i32, %arg1: memref<2x4x256xf32, #tpu.memory_space<vmem>>, %arg2: memref<4x4xf32, #tpu.memory_space<vmem>>, %arg3: memref<2x4x256xf32, #tpu.memory_space<vmem>>) attributes {dimension_semantics = [#tpu.dimension_semantics<parallel>], iteration_bounds = array<i64: 1>, scalar_prefetch = 0 : i64, scratch_operands = 0 : i64, tpu.core_type = #tpu.core_type<tc>, window_params = [{transform_indices = @transform_0, window_bounds = array<i64: 2, 4, 256>}, {pipeline_mode = #tpu.pipeline_mode<synchronous>, transform_indices = @transform_1, window_bounds = array<i64: 4, 4>}, {transform_indices = @transform_2, window_bounds = array<i64: 2, 4, 256>}]} {
    %c0 = arith.constant 0 : index
    %c0_0 = arith.constant 0 : index
    %c0_1 = arith.constant 0 : index
    %0 = vector.load %arg1[%c0, %c0_0, %c0_1] : memref<2x4x256xf32, #tpu.memory_space<vmem>>, vector<2x4x256xf32>
    %cst = arith.constant dense<0.000000e+00> : vector<2x4xf32>
    %1 = vector.multi_reduction <add>, %0, %cst [2] : vector<2x4x256xf32> to vector<2x4xf32>
    %cst_2 = arith.constant 2.560000e+02 : f32
    %2 = vector.broadcast %cst_2 : f32 to vector<2x4xf32>
    %3 = arith.divf %1, %2 : vector<2x4xf32>
    %c0_3 = arith.constant 0 : index
    %c0_4 = arith.constant 0 : index
    %4 = vector.load %arg2[%c0_3, %c0_4] : memref<4x4xf32, #tpu.memory_space<vmem>>, vector<4x4xf32>
    %cst_5 = arith.constant dense<0.000000e+00> : vector<2x4xf32>
    %5 = tpu.matmul %3, %4, %cst_5 {dimension_numbers = #tpu.dot_dimension_numbers<[1], [0], [0], [1], [0, 0, 1, 1], [], []>} : vector<2x4xf32>, vector<4x4xf32>, vector<2x4xf32> -> vector<2x4xf32>
    %6 = arith.negf %5 : vector<2x4xf32>
    %7 = math.exp %6 : vector<2x4xf32>
    %cst_6 = arith.constant 1.000000e+00 : f32
    %8 = vector.broadcast %cst_6 : f32 to vector<2x4xf32>
    %9 = arith.addf %8, %7 : vector<2x4xf32>
    %10 = arith.divf %8, %9 : vector<2x4xf32>
    %11 = vector.shape_cast %10 : vector<2x4xf32> to vector<2x4x1xf32>
    %12 = vector.broadcast %11 : vector<2x4x1xf32> to vector<2x4x256xf32>
    %13 = arith.mulf %0, %12 : vector<2x4x256xf32>
    %c0_7 = arith.constant 0 : index
    %c0_8 = arith.constant 0 : index
    %c0_9 = arith.constant 0 : index
    %14 = vector.load %arg3[%c0_7, %c0_8, %c0_9] : memref<2x4x256xf32, #tpu.memory_space<vmem>>, vector<2x4x256xf32>
    tpu.vector_store %arg3[%c0_7, %c0_8, %c0_9], %13 {strides = array<i32>} : memref<2x4x256xf32, #tpu.memory_space<vmem>>, vector<2x4x256xf32>,
    return
  }
  func.func @transform_0(%arg0: i32) -> (i32, i32, i32) {
    %c0_i32 = arith.constant 0 : i32
    %c0_i32_0 = arith.constant 0 : i32
    %c0_i32_1 = arith.constant 0 : i32
    return %arg0, %c0_i32, %c0_i32_0 : i32, i32, i32
  }
  func.func @transform_1(%arg0: i32) -> (i32, i32) {
    %c0_i32 = arith.constant 0 : i32
    %c0_i32_0 = arith.constant 0 : i32
    %c0_i32_1 = arith.constant 0 : i32
    return %c0_i32, %c0_i32_0 : i32, i32
  }
  func.func @transform_2(%arg0: i32) -> (i32, i32, i32) {
    %c0_i32 = arith.constant 0 : i32
    %c0_i32_0 = arith.constant 0 : i32
    %c0_i32_1 = arith.constant 0 : i32
    return %arg0, %c0_i32, %c0_i32_0 : i32, i32, i32
  }
}

module attributes {stable_mosaic.version = 11 : i64} {
  func.func @eca_kernel(%arg0: i32, %arg1: memref<2x4x256xf32, #tpu.memory_space<vmem>>, %arg2: memref<4x4xf32, #tpu.memory_space<vmem>>, %arg3: memref<2x4x256xf32, #tpu.memory_space<vmem>>) attributes {dimension_semantics = [#tpu.dimension_semantics<parallel>], iteration_bounds = array<i64: 1>, scalar_prefetch = 0 : i64, scratch_operands = 0 : i64, tpu.core_type = #tpu.core_type<tc>, window_params = [{transform_indices = @transform_0, window_bounds = array<i64: 2, 4, 256>}, {pipeline_mode = #tpu.pipeline_mode<synchronous>, transform_indices = @transform_1, window_bounds = array<i64: 4, 4>}, {transform_indices = @transform_2, window_bounds = array<i64: 2, 4, 256>}]} {
    %c0 = arith.constant 0 : index
    %c0_0 = arith.constant 0 : index
    %c0_1 = arith.constant 0 : index
    %0 = vector.load %arg1[%c0, %c0_0, %c0_1] : memref<2x4x256xf32, #tpu.memory_space<vmem>>, vector<2x4x256xf32>
    %cst = arith.constant dense<0.000000e+00> : vector<2x4xf32>
    %1 = vector.multi_reduction <add>, %0, %cst [2] : vector<2x4x256xf32> to vector<2x4xf32>
    %cst_2 = arith.constant 2.560000e+02 : f32
    %2 = vector.broadcast %cst_2 : f32 to vector<2x4xf32>
    %3 = arith.divf %1, %2 : vector<2x4xf32>
    %c0_3 = arith.constant 0 : index
    %c0_4 = arith.constant 0 : index
    %4 = vector.load %arg2[%c0_3, %c0_4] : memref<4x4xf32, #tpu.memory_space<vmem>>, vector<4x4xf32>
    %cst_5 = arith.constant dense<0.000000e+00> : vector<2x4xf32>
    %5 = tpu.matmul %3, %4, %cst_5 {dimension_numbers = #tpu.dot_dimension_numbers<[1], [0], [0], [1], [0, 0, 1, 1], [], []>} : vector<2x4xf32>, vector<4x4xf32>, vector<2x4xf32> -> vector<2x4xf32>
    %6 = arith.negf %5 : vector<2x4xf32>
    %7 = math.exp %6 : vector<2x4xf32>
    %cst_6 = arith.constant 1.000000e+00 : f32
    %8 = vector.broadcast %cst_6 : f32 to vector<2x4xf32>
    %9 = arith.addf %8, %7 : vector<2x4xf32>
    %10 = arith.divf %8, %9 : vector<2x4xf32>
    %11 = vector.shape_cast %10 : vector<2x4xf32> to vector<2x4x1xf32>
    %12 = vector.broadcast %11 : vector<2x4x1xf32> to vector<2x4x256xf32>
    %13 = arith.mulf %0, %12 : vector<2x4x256xf32>
    %c0_7 = arith.constant 0 : index
    %c0_8 = arith.constant 0 : index
    %c0_9 = arith.constant 0 : index
    %14 = vector.load %arg3[%c0_7, %c0_8, %c0_9] : memref<2x4x256xf32, #tpu.memory_space<vmem>>, vector<2x4x256xf32>
    tpu.vector_store %arg3[%c0_7, %c0_8, %c0_9], %13 {strides = array<i32>} : memref<2x4x256xf32, #tpu.memory_space<vmem>>, vector<2x4x256xf32>,
    return
  }
  func.func @transform_0(%arg0: i32) -> (i32, i32, i32) {
    %c0_i32 = arith.constant 0 : i32
    %c0_i32_0 = arith.constant 0 : i32
    %c0_i32_1 = arith.constant 0 : i32
    return %arg0, %c0_i32, %c0_i32_0 : i32, i32, i32
  }
  func.func @transform_1(%arg0: i32) -> (i32, i32) {
    %c0_i32 = arith.constant 0 : i32
    %c0_i32_0 = arith.constant 0 : i32
    %c0_i32_1 = arith.constant 0 : i32
    return %c0_i32, %c0_i32_0 : i32, i32
  }
  func.func @transform_2(%arg0: i32) -> (i32, i32, i32) {
    %c0_i32 = arith.constant 0 : i32
    %c0_i32_0 = arith.constant 0 : i32
    %c0_i32_1 = arith.constant 0 : i32
    return %arg0, %c0_i32, %c0_i32_0 : i32, i32, i32
  }
}

</mosaic_0001>

<bundles_post_ra>
// kernel: tpu_custom_call.1
= control target key start
LH: loop header
LB: loop body
LE: loop exit
PB: predicated region body
PF: predicated region fallthrough
CT: control target
= control target key end

     0   :  { %7 = vsyncpa [#allocation3], 0  ;;  %s344_s0 = inlined_call_operand.hbm [shape: f32[2,4,256], index: 0, kind: input, shape index: {}]   ;;  %s345_s1 = inlined_call_operand.hbm [shape: f32[4,4], index: 1, kind: input, shape index: {}]   ;;  %s346_s2 = inlined_call_operand.hbm [shape: f32[2,4,256], index: 2, kind: output, shape index: {}]  }
   0x1   :  { %8 = vsyncpa [#allocation6], 0 }
   0x2   :  { %9 = vsyncpa [#allocation4], 0  ;;  %s301_s9 = smov [#allocation2]  }
   0x3   :  { %s15_s10 = sshll.u32 %s301_s9, 4  ;;  %s16_s10 = int_to_ptr.vmem [resolvable:$true] %s15_s10 }
   0x4   :  { %s243_s11 = scalar_lea.vmem %s16_s10, 256  ;;  %p248_p1 = scmp.lt.s32.totalorder %s16_s10, %s16_s10 }
   0x5   :  { %p244_p0 = scmp.ne.s32.totalorder %s16_s10, %s243_s11  ;;  %p249_p2 = scmp.lt.s32.totalorder %s243_s11, %s243_s11 }
   0x7   :  { %p250_p3 = por %p249_p2, %p248_p1 }
   0x9   :  { %p251_p4 = pnand %p250_p3, %p244_p0 }
   0xb   :  { %254 = shalt.err (!%p251_p4)
}
   0xc   :  { %s302_s12 = smov 128   ;;  %s303_s13 = smov 8  }
   0xd   :  { %21 = dma.hbm_to_vmem [thread:$0]  %s344_s0, 256, %s16_s10, [#allocation3], %s302_s12, %s302_s12, %s303_s13  }
   0xe   :  { %s304_s16 = smov [#allocation5]  }
   0xf   :  { %s28_s17 = sshll.u32 %s304_s16, 4  ;;  %s29_s17 = int_to_ptr.vmem [resolvable:$true] %s28_s17 }
  0x10   :  { %s263_s18 = scalar_lea.vmem %s29_s17, 64  ;;  %p268_p6 = scmp.lt.s32.totalorder %s29_s17, %s29_s17 }
  0x11   :  { %p264_p5 = scmp.ne.s32.totalorder %s29_s17, %s263_s18  ;;  %p269_p7 = scmp.lt.s32.totalorder %s263_s18, %s263_s18 }
  0x13   :  { %p270_p8 = por %p269_p7, %p268_p6 }
  0x15   :  { %p271_p9 = pnand %p270_p8, %p264_p5 }
  0x17   :  { %274 = shalt.err (!%p271_p9)
}
  0x18   :  { %31 = dma.hbm_to_vmem [thread:$0]  %s345_s1, 64, %s29_s17, [#allocation6]  }
  0x19   :  { %295 = dma.done.wait [#allocation3], 256  }
  0x1a   :  { %296 = vsyncadd [#allocation3], 4294967040 }
  0x1b   :  { %297 = dma.done.wait [#allocation6], 64  }
  0x1c   :  { %298 = vsyncadd [#allocation6], 4294967232  ;;  %vm46_vm0 = vcmask 1043456   ;;  %v38_v0 = vld [vmem:[#allocation2] sm:$0xff]  ;;  %v39_v1 = vld [vmem:[#allocation2 + $0x8] sm:$0xff]  ;;  %v305_v11 = vmov 0.0   ;;  %v63_v12 = vlaneseq }
  0x1d   :  { %v42_v2 = vcombine.high %v38_v0, %v38_v0  ;;  %v47_v3 = vsel %vm46_vm0, %v38_v0, 0.0  ;;  %v43_v4 = vcombine.high %v39_v1, %v39_v1  ;;  %v52_v6 = vsel %vm46_vm0, %v39_v1, 0.0  ;;  %v60_v10 = vld [vmem:[#allocation5] sm:$0xf]  ;;  %216 = vmatprep.subr.mxu0 %v305_v11  ;;  %s308_s0 = smov [#allocation7]  }
  0x1e   :  { %vm306_vm1 = vmmov 0   ;;  %217 = vmatpush3.msk.msra.mxu0 %vm46_vm0, %v60_v10  ;;  %v64_v13 = vand.u32 127, %v63_v12  ;;  %v66_v14 = vshrl.u32 %v63_v12, 7  ;;  %vm73_vm2 = vcmask 1041409   ;;  %s198_s1 = sshll.u32 %s308_s0, 4  ;;  %s199_s1 = int_to_ptr.vmem [resolvable:$true] %s198_s1 }
  0x1f   :  { %v48_v5 = vsel %vm46_vm0, %v42_v2, 0.0  ;;  %v53_v7 = vsel %vm46_vm0, %v43_v4, 0.0  ;;  %218 = vmatprep.mubr.msk.f32.mxu0 %vm306_vm1, %v305_v11  ;;  %vm75_vm3 = vcmask 31744   ;;  %v307_v33 = vmov 839922192   ;;  %s275_s21 = scalar_lea.vmem %s199_s1, 256  ;;  %p280_p11 = scmp.lt.s32.totalorder %s199_s1, %s199_s1 }
  0x20   :  { %v49_v8 = vadd.f32 %v48_v5, %v47_v3  ;;  %v54_v9 = vadd.f32 %v53_v7, %v52_v6  ;;  %v67_v16 = vsub.s32 %v64_v13, %v66_v14  ;;  %v159_v28 = vsub.s32 0, %v66_v14  ;;  %p276_p10 = scmp.ne.s32.totalorder %s199_s1, %s275_s21  ;;  %p281_p12 = scmp.lt.s32.totalorder %s275_s21, %s275_s21 }
  0x21   :  { %v166_v31 = vsub.s32 1, %v66_v14  ;;  %v174_v34 = vunpack.c.l.s4 %v307_v33 }
  0x22   :  { %50 = vadd.xlane.f32.xlu0 %v49_v8  ;;  %p282_p13 = por %p281_p12, %p280_p11 }
  0x23   :  { %v175_v35 = vunpack.c.0.s8 %v174_v34 }
  0x24   :  { %p283_p0 = pnand %p282_p13, %p276_p10 }
  0x25   :  { %v178_v36 = vsub.s32 %v175_v35, %v66_v14 }
  0x26   :  { %55 = vadd.xlane.f32.xlu0 %v54_v9 }
  0xab   :  { %v51_v15 = vpop.xlane.xlu0 %50 }
  0xac   :  { %v58_v17 = vmul.f32 0.00390625, %v51_v15 }
  0xae   :  { %v68_v20 = vrot.slane %v58_v17, %v67_v16 }
  0xaf   :  { %v56_v18 = vpop.xlane.xlu0 %55 }
  0xb0   :  { %v59_v19 = vmul.f32 0.00390625, %v56_v18 }
  0xb2   :  { %v72_v21 = vrot.slane %v59_v19, %v67_v16 }
  0xb4   :  { %v74_v22 = vsel %vm73_vm2, %v72_v21, %v68_v20 }
  0xb5   :  { %219 = vmatmul.mubr.msk.f32.vlgmr.msra.gmra.mxu0 %vm75_vm3, %v74_v22 }
 0x175   :  { %v147_v23 = vpop.f32.mrf.mxu0 }
 0x176   :  { %v213_v24 = vmul.f32 -1.442695, %v147_v23 }
 0x177   :  { %v220_v25 = vpop.f32.mrf.mxu0 }
 0x178   :  { %231 = vpow2.f32 %v213_v24 }
 0x185   :  { %v232_v26 = vpop.eup %231 }
 0x186   :  { %v154_v27 = vadd.f32 1.0, %v232_v26 }
 0x188   :  { %233 = vrcp.f32 %v154_v27 }
 0x195   :  { %v234_v29 = vpop.eup %233 }
 0x196   :  { %v160_v30 = vrot.slane %v234_v29, %v159_v28  ;;  %v167_v32 = vrot.slane %v234_v29, %v166_v31 }
 0x198   :  { %162 = vbcast.lane.b32.xlu1 %v160_v30, 256 }
 0x19c   :  { %169 = vbcast.lane.b32.xlu1 %v167_v32, 256 }
 0x20a   :  { %v163_v37 = vpop.permute.xlu1 %162 }
 0x20b   :  { %v179_v38 = vrot.slane %v163_v37, %v178_v36 }
 0x20d   :  { %v189_v39 = vmul.f32 %v179_v38, %v38_v0 }
 0x20e   :  { %v170_v40 = vpop.permute.xlu1 %169 }
 0x20f   :  { %191 = vst [vmem:[#allocation7] sm:$0xff] %v189_v39  ;;  %v186_v41 = vrot.slane %v170_v40, %v178_v36 }
 0x211   :  { %v190_v42 = vmul.f32 %v186_v41, %v39_v1 }
 0x213   :  { %192 = vst [vmem:[#allocation7 + $0x8] sm:$0xff] %v190_v42 }
 0x214   :  { %286 = shalt.err (!%p283_p0)
}
 0x215   :  { %204 = dma.vmem_to_hbm [thread:$0]  %s199_s1, 256, %s346_s2, [#allocation4], %s302_s12, %s302_s12, %s303_s13  }
 0x216   :  { %299 = dma.done.wait [#allocation4], 256  }
 0x217   :  { %300 = vsyncadd [#allocation4], 4294967040 }
 0x218   :  { %208 = vsyncpa [#allocation3], 1 }
 0x219   :  { %209 = vsyncpa [#allocation6], 1 }
 0x21a   :  { %210 = vsyncpa [#allocation4], 1 }

// kernel: tpu_custom_call.1
= control target key start
LH: loop header
LB: loop body
LE: loop exit
PB: predicated region body
PF: predicated region fallthrough
CT: control target
= control target key end

     0   :  { %7 = vsyncpa [#allocation3], 0  ;;  %s344_s0 = inlined_call_operand.hbm [shape: f32[2,4,256], index: 0, kind: input, shape index: {}]   ;;  %s345_s1 = inlined_call_operand.hbm [shape: f32[4,4], index: 1, kind: input, shape index: {}]   ;;  %s346_s2 = inlined_call_operand.hbm [shape: f32[2,4,256], index: 2, kind: output, shape index: {}]  }
   0x1   :  { %8 = vsyncpa [#allocation6], 0 }
   0x2   :  { %9 = vsyncpa [#allocation4], 0  ;;  %s301_s9 = smov [#allocation2]  }
   0x3   :  { %s15_s10 = sshll.u32 %s301_s9, 4  ;;  %s16_s10 = int_to_ptr.vmem [resolvable:$true] %s15_s10 }
   0x4   :  { %s243_s11 = scalar_lea.vmem %s16_s10, 256  ;;  %p248_p1 = scmp.lt.s32.totalorder %s16_s10, %s16_s10 }
   0x5   :  { %p244_p0 = scmp.ne.s32.totalorder %s16_s10, %s243_s11  ;;  %p249_p2 = scmp.lt.s32.totalorder %s243_s11, %s243_s11 }
   0x7   :  { %p250_p3 = por %p249_p2, %p248_p1 }
   0x9   :  { %p251_p4 = pnand %p250_p3, %p244_p0 }
   0xb   :  { %254 = shalt.err (!%p251_p4)
}
   0xc   :  { %s302_s12 = smov 128   ;;  %s303_s13 = smov 8  }
   0xd   :  { %21 = dma.hbm_to_vmem [thread:$0]  %s344_s0, 256, %s16_s10, [#allocation3], %s302_s12, %s302_s12, %s303_s13  }
   0xe   :  { %s304_s16 = smov [#allocation5]  }
   0xf   :  { %s28_s17 = sshll.u32 %s304_s16, 4  ;;  %s29_s17 = int_to_ptr.vmem [resolvable:$true] %s28_s17 }
  0x10   :  { %s263_s18 = scalar_lea.vmem %s29_s17, 64  ;;  %p268_p6 = scmp.lt.s32.totalorder %s29_s17, %s29_s17 }
  0x11   :  { %p264_p5 = scmp.ne.s32.totalorder %s29_s17, %s263_s18  ;;  %p269_p7 = scmp.lt.s32.totalorder %s263_s18, %s263_s18 }
  0x13   :  { %p270_p8 = por %p269_p7, %p268_p6 }
  0x15   :  { %p271_p9 = pnand %p270_p8, %p264_p5 }
  0x17   :  { %274 = shalt.err (!%p271_p9)
}
  0x18   :  { %31 = dma.hbm_to_vmem [thread:$0]  %s345_s1, 64, %s29_s17, [#allocation6]  }
  0x19   :  { %295 = dma.done.wait [#allocation3], 256  }
  0x1a   :  { %296 = vsyncadd [#allocation3], 4294967040 }
  0x1b   :  { %297 = dma.done.wait [#allocation6], 64  }
  0x1c   :  { %298 = vsyncadd [#allocation6], 4294967232  ;;  %vm46_vm0 = vcmask 1043456   ;;  %v38_v0 = vld [vmem:[#allocation2] sm:$0xff]  ;;  %v39_v1 = vld [vmem:[#allocation2 + $0x8] sm:$0xff]  ;;  %v305_v11 = vmov 0.0   ;;  %v63_v12 = vlaneseq }
  0x1d   :  { %v42_v2 = vcombine.high %v38_v0, %v38_v0  ;;  %v47_v3 = vsel %vm46_vm0, %v38_v0, 0.0  ;;  %v43_v4 = vcombine.high %v39_v1, %v39_v1  ;;  %v52_v6 = vsel %vm46_vm0, %v39_v1, 0.0  ;;  %v60_v10 = vld [vmem:[#allocation5] sm:$0xf]  ;;  %216 = vmatprep.subr.mxu0 %v305_v11  ;;  %s308_s0 = smov [#allocation7]  }
  0x1e   :  { %vm306_vm1 = vmmov 0   ;;  %217 = vmatpush3.msk.msra.mxu0 %vm46_vm0, %v60_v10  ;;  %v64_v13 = vand.u32 127, %v63_v12  ;;  %v66_v14 = vshrl.u32 %v63_v12, 7  ;;  %vm73_vm2 = vcmask 1041409   ;;  %s198_s1 = sshll.u32 %s308_s0, 4  ;;  %s199_s1 = int_to_ptr.vmem [resolvable:$true] %s198_s1 }
  0x1f   :  { %v48_v5 = vsel %vm46_vm0, %v42_v2, 0.0  ;;  %v53_v7 = vsel %vm46_vm0, %v43_v4, 0.0  ;;  %218 = vmatprep.mubr.msk.f32.mxu0 %vm306_vm1, %v305_v11  ;;  %vm75_vm3 = vcmask 31744   ;;  %v307_v33 = vmov 839922192   ;;  %s275_s21 = scalar_lea.vmem %s199_s1, 256  ;;  %p280_p11 = scmp.lt.s32.totalorder %s199_s1, %s199_s1 }
  0x20   :  { %v49_v8 = vadd.f32 %v48_v5, %v47_v3  ;;  %v54_v9 = vadd.f32 %v53_v7, %v52_v6  ;;  %v67_v16 = vsub.s32 %v64_v13, %v66_v14  ;;  %v159_v28 = vsub.s32 0, %v66_v14  ;;  %p276_p10 = scmp.ne.s32.totalorder %s199_s1, %s275_s21  ;;  %p281_p12 = scmp.lt.s32.totalorder %s275_s21, %s275_s21 }
  0x21   :  { %v166_v31 = vsub.s32 1, %v66_v14  ;;  %v174_v34 = vunpack.c.l.s4 %v307_v33 }
  0x22   :  { %50 = vadd.xlane.f32.xlu0 %v49_v8  ;;  %p282_p13 = por %p281_p12, %p280_p11 }
  0x23   :  { %v175_v35 = vunpack.c.0.s8 %v174_v34 }
  0x24   :  { %p283_p0 = pnand %p282_p13, %p276_p10 }
  0x25   :  { %v178_v36 = vsub.s32 %v175_v35, %v66_v14 }
  0x26   :  { %55 = vadd.xlane.f32.xlu0 %v54_v9 }
  0xab   :  { %v51_v15 = vpop.xlane.xlu0 %50 }
  0xac   :  { %v58_v17 = vmul.f32 0.00390625, %v51_v15 }
  0xae   :  { %v68_v20 = vrot.slane %v58_v17, %v67_v16 }
  0xaf   :  { %v56_v18 = vpop.xlane.xlu0 %55 }
  0xb0   :  { %v59_v19 = vmul.f32 0.00390625, %v56_v18 }
  0xb2   :  { %v72_v21 = vrot.slane %v59_v19, %v67_v16 }
  0xb4   :  { %v74_v22 = vsel %vm73_vm2, %v72_v21, %v68_v20 }
  0xb5   :  { %219 = vmatmul.mubr.msk.f32.vlgmr.msra.gmra.mxu0 %vm75_vm3, %v74_v22 }
 0x175   :  { %v147_v23 = vpop.f32.mrf.mxu0 }
 0x176   :  { %v213_v24 = vmul.f32 -1.442695, %v147_v23 }
 0x177   :  { %v220_v25 = vpop.f32.mrf.mxu0 }
 0x178   :  { %231 = vpow2.f32 %v213_v24 }
 0x185   :  { %v232_v26 = vpop.eup %231 }
 0x186   :  { %v154_v27 = vadd.f32 1.0, %v232_v26 }
 0x188   :  { %233 = vrcp.f32 %v154_v27 }
 0x195   :  { %v234_v29 = vpop.eup %233 }
 0x196   :  { %v160_v30 = vrot.slane %v234_v29, %v159_v28  ;;  %v167_v32 = vrot.slane %v234_v29, %v166_v31 }
 0x198   :  { %162 = vbcast.lane.b32.xlu1 %v160_v30, 256 }
 0x19c   :  { %169 = vbcast.lane.b32.xlu1 %v167_v32, 256 }
 0x20a   :  { %v163_v37 = vpop.permute.xlu1 %162 }
 0x20b   :  { %v179_v38 = vrot.slane %v163_v37, %v178_v36 }
 0x20d   :  { %v189_v39 = vmul.f32 %v179_v38, %v38_v0 }
 0x20e   :  { %v170_v40 = vpop.permute.xlu1 %169 }
 0x20f   :  { %191 = vst [vmem:[#allocation7] sm:$0xff] %v189_v39  ;;  %v186_v41 = vrot.slane %v170_v40, %v178_v36 }
 0x211   :  { %v190_v42 = vmul.f32 %v186_v41, %v39_v1 }
 0x213   :  { %192 = vst [vmem:[#allocation7 + $0x8] sm:$0xff] %v190_v42 }
 0x214   :  { %286 = shalt.err (!%p283_p0)
}
 0x215   :  { %204 = dma.vmem_to_hbm [thread:$0]  %s199_s1, 256, %s346_s2, [#allocation4], %s302_s12, %s302_s12, %s303_s13  }
 0x216   :  { %299 = dma.done.wait [#allocation4], 256  }
 0x217   :  { %300 = vsyncadd [#allocation4], 4294967040 }
 0x218   :  { %208 = vsyncpa [#allocation3], 1 }
 0x219   :  { %209 = vsyncpa [#allocation6], 1 }
 0x21a   :  { %210 = vsyncpa [#allocation4], 1 }

</bundles_post_ra>
